<compile_context>
chip_gen: v7x
topology: tpu7x:2x2x1
jax: 0.10.0
libtpu: 0.0.40
codegen_flags: <defaults>
</compile_context>

<pallas_src>
import functools

import jax
import jax.numpy as jnp
from jax.experimental import pallas as pl
from jax.experimental.pallas import tpu as pltpu


def _round_up(x, m):
    return ((x + m - 1) // m) * m


def _mlp_softmax_kernel(x_ref, w1_ref, b1_ref, w2_ref, b2_ref, w3_ref, b3_ref,
                        o_ref):
    """Fused 3-layer MLP + softmax for one (tb, input_dim) batch tile."""
    # Cast the streamed f32 activations to the MXU dtype in-register.
    x = x_ref[...].astype(w1_ref.dtype)

    # fc1 + ReLU (MXU matmul with f32 accumulation; bias/ReLU in f32).
    h1 = jnp.dot(x, w1_ref[...], preferred_element_type=jnp.float32) + b1_ref[...]
    h1 = jnp.maximum(h1, 0.0)

    # fc2 + ReLU.
    h2 = jnp.dot(h1.astype(w2_ref.dtype), w2_ref[...],
                 preferred_element_type=jnp.float32) + b2_ref[...]
    h2 = jnp.maximum(h2, 0.0)

    # fc3 + softmax over the lane-dense (padded-to-128) class axis.
    # Padded classes have weight 0 and bias -1e30 (kept f32, never cast to the
    # MXU dtype), so exp() underflows to exactly 0 and they contribute nothing
    # to the denominator.
    logits = jnp.dot(h2.astype(w3_ref.dtype), w3_ref[...],
                     preferred_element_type=jnp.float32) + b3_ref[...]
    m = jnp.max(logits, axis=-1, keepdims=True)
    e = jnp.exp(logits - m)
    denom = jnp.sum(e, axis=-1, keepdims=True)
    # Exact divide (NOT pl.reciprocal(approx=True)): keeps each row summing to
    # 1 within f32 rounding, matching torch.nn.functional.softmax.
    o_ref[...] = (e / denom).astype(o_ref.dtype)


@functools.partial(jax.jit, static_argnames=("block_b", "mxu_dtype", "out_dtype"))
def nn_forward(x, params, *, block_b=1024, mxu_dtype=jnp.bfloat16,
               out_dtype=jnp.float32):
    """Forward pass of `_NN`.

    x:      [B, input_dim] float32.
    params: dict with w1 [in,128], b1 [1,128], w2 [128,128], b2 [1,128],
            w3 [128,num_class], b3 [1,num_class]  (weights input-major).
    Returns softmax probabilities, shape [B, num_class], float32.
    """
    w1, b1, w2, b2, w3, b3 = (params["w1"], params["b1"], params["w2"],
                              params["b2"], params["w3"], params["b3"])
    B, input_dim = x.shape
    hidden = w1.shape[1]
    num_class = w3.shape[1]
    assert num_class >= 1

    # ---- lane-dense class padding (multiple of 128, >= 128) ----
    c_pad = max(128, _round_up(num_class, 128))
    w3p = jnp.zeros((hidden, c_pad), w3.dtype).at[:, :num_class].set(w3)
    b3p = jnp.full((1, c_pad), -1e30, jnp.float32).at[:, :num_class].set(
        b3.astype(jnp.float32))

    # ---- batch tiling: tb rows / grid step (multiple of 16), no batch pad ----
    row = 16
    tb = min(block_b, _round_up(B, row))
    if tb >= B and B > row:
        # Guarantee >= 2 grid steps so the "parallel" batch axis can be
        # sharded across both v7x TensorCores (no-op on v5e/v6e).
        tb = _round_up(pl.cdiv(B, 2), row)
    tb = max(row, (tb // row) * row)
    grid = (pl.cdiv(B, tb),)

    # ---- operand dtypes: weights in MXU dtype, x streamed as-is, biases
    #      (incl. the -1e30 padding) kept f32 ----
    w1c = w1.astype(mxu_dtype)
    w2c = w2.astype(mxu_dtype)
    w3c = w3p.astype(mxu_dtype)
    b1c = b1.astype(jnp.float32)
    b2c = b2.astype(jnp.float32)

    w_isz = jnp.dtype(mxu_dtype).itemsize
    o_isz = jnp.dtype(out_dtype).itemsize
    x_isz = jnp.dtype(x.dtype).itemsize

    resident = ((w1c.size + w2c.size + w3c.size) * w_isz
                + (b1c.size + b2c.size + b3p.size) * 4)
    streamed = 2 * tb * input_dim * x_isz + 2 * tb * c_pad * o_isz
    live = tb * (2 * hidden + 2 * c_pad) * 4  # f32 intermediates
    vmem_limit = int(max(8 << 20,
                         min(64 << 20,
                             2 * resident + streamed + live + (4 << 20))))

    cost = pl.CostEstimate(
        flops=2 * B * (input_dim * hidden + hidden * hidden + hidden * c_pad),
        transcendentals=B * c_pad,  # exp per (row, padded class)
        bytes_accessed=(B * input_dim * x_isz + resident + B * c_pad * o_isz),
    )

    out = pl.pallas_call(
        _mlp_softmax_kernel,
        out_shape=jax.ShapeDtypeStruct((B, c_pad), out_dtype),
        grid=grid,
        in_specs=[
            pl.BlockSpec((tb, input_dim), lambda i: (i, 0)),  # streamed x tile
            pl.BlockSpec(w1c.shape, lambda i: (0, 0)),        # resident weights
            pl.BlockSpec(b1c.shape, lambda i: (0, 0)),
            pl.BlockSpec(w2c.shape, lambda i: (0, 0)),
            pl.BlockSpec(b2c.shape, lambda i: (0, 0)),
            pl.BlockSpec(w3c.shape, lambda i: (0, 0)),
            pl.BlockSpec(b3p.shape, lambda i: (0, 0)),
        ],
        out_specs=pl.BlockSpec((tb, c_pad), lambda i: (i, 0)),
        compiler_params=pltpu.CompilerParams(
            dimension_semantics=("parallel",),
            vmem_limit_bytes=vmem_limit,
        ),
        cost_estimate=cost,
    )(x, w1c, b1c, w2c, b2c, w3c, b3p)

    return out[:, :num_class].astype(jnp.float32)


def init_params(key, input_dim, num_class, hidden=128):
    """Deterministic synthetic init (shapes match the PyTorch module)."""
    k1, k2, k3, k4, k5, k6 = jax.random.split(key, 6)
    s1 = 1.0 / jnp.sqrt(input_dim)
    s2 = 1.0 / jnp.sqrt(hidden)
    return {
        "w1": jax.random.uniform(k1, (input_dim, hidden), jnp.float32, -s1, s1),
        "b1": jax.random.uniform(k2, (1, hidden), jnp.float32, -s1, s1),
        "w2": jax.random.uniform(k3, (hidden, hidden), jnp.float32, -s2, s2),
        "b2": jax.random.uniform(k4, (1, hidden), jnp.float32, -s2, s2),
        "w3": jax.random.uniform(k5, (hidden, num_class), jnp.float32, -s2, s2),
        "b3": jax.random.uniform(k6, (1, num_class), jnp.float32, -s2, s2),
    }


if __name__ == "__main__":
    input_dim = 32
    num_class = 10
    batch = 33  # not a multiple of the tile -> exercises the ragged last block

    key = jax.random.PRNGKey(0)
    kx, kp = jax.random.split(key)
    x = jax.random.normal(kx, (batch, input_dim), jnp.float32)
    params = init_params(kp, input_dim, num_class)

    # Small block_b so the test exercises a multi-step grid with a ragged tail
    # (tiles of 16 rows: 16 + 16 + 1).
    out = jax.block_until_ready(nn_forward(x, params, block_b=16))
    assert out.shape == (batch, num_class)

    # Reference 1: same bf16-MXU / f32-accumulate precision as the kernel.
    bf16 = jnp.bfloat16
    h1 = jnp.maximum(
        jnp.dot(x.astype(bf16), params["w1"].astype(bf16),
                preferred_element_type=jnp.float32) + params["b1"], 0.0)
    h2 = jnp.maximum(
        jnp.dot(h1.astype(bf16), params["w2"].astype(bf16),
                preferred_element_type=jnp.float32) + params["b2"], 0.0)
    logits = (jnp.dot(h2.astype(bf16), params["w3"].astype(bf16),
                      preferred_element_type=jnp.float32) + params["b3"])
    ref_bf16 = jax.nn.softmax(logits, axis=1)

    # Reference 2: full f32 forward pass (PyTorch-equivalent semantics).
    h1f = jnp.maximum(x @ params["w1"] + params["b1"], 0.0)
    h2f = jnp.maximum(h1f @ params["w2"] + params["b2"], 0.0)
    ref_f32 = jax.nn.softmax(h2f @ params["w3"] + params["b3"], axis=1)

    assert jnp.allclose(out, ref_bf16, atol=2e-3, rtol=2e-2), \
        float(jnp.max(jnp.abs(out - ref_bf16)))
    assert jnp.allclose(out, ref_f32, atol=2e-2, rtol=5e-2), \
        float(jnp.max(jnp.abs(out - ref_f32)))
    # Exact softmax normalization -> rows sum to 1 up to f32 rounding.
    assert jnp.allclose(jnp.sum(out, axis=1), 1.0, atol=1e-3)

    print("KERNEL_OK")
</pallas_src>

<mosaic_0001>
module attributes {stable_mosaic.version = 11 : i64} {
  func.func @_mlp_softmax_kernel(%arg0: i32, %arg1: memref<16x32xf32, #tpu.memory_space<vmem>>, %arg2: memref<32x128xbf16, #tpu.memory_space<vmem>>, %arg3: memref<1x128xf32, #tpu.memory_space<vmem>>, %arg4: memref<128x128xbf16, #tpu.memory_space<vmem>>, %arg5: memref<1x128xf32, #tpu.memory_space<vmem>>, %arg6: memref<128x128xbf16, #tpu.memory_space<vmem>>, %arg7: memref<1x128xf32, #tpu.memory_space<vmem>>, %arg8: memref<16x128xf32, #tpu.memory_space<vmem>>) attributes {dimension_semantics = [#tpu.dimension_semantics<parallel>], iteration_bounds = array<i64: 3>, scalar_prefetch = 0 : i64, scratch_operands = 0 : i64, tpu.core_type = #tpu.core_type<tc>, window_params = [{transform_indices = @transform_0, window_bounds = array<i64: 16, 32>}, {pipeline_mode = #tpu.pipeline_mode<synchronous>, transform_indices = @transform_1, window_bounds = array<i64: 32, 128>}, {pipeline_mode = #tpu.pipeline_mode<synchronous>, transform_indices = @transform_2, window_bounds = array<i64: 1, 128>}, {pipeline_mode = #tpu.pipeline_mode<synchronous>, transform_indices = @transform_3, window_bounds = array<i64: 128, 128>}, {pipeline_mode = #tpu.pipeline_mode<synchronous>, transform_indices = @transform_4, window_bounds = array<i64: 1, 128>}, {pipeline_mode = #tpu.pipeline_mode<synchronous>, transform_indices = @transform_5, window_bounds = array<i64: 128, 128>}, {pipeline_mode = #tpu.pipeline_mode<synchronous>, transform_indices = @transform_6, window_bounds = array<i64: 1, 128>}, {transform_indices = @transform_7, window_bounds = array<i64: 16, 128>}]} {
    %c0 = arith.constant 0 : index
    %c0_0 = arith.constant 0 : index
    %0 = vector.load %arg1[%c0, %c0_0] : memref<16x32xf32, #tpu.memory_space<vmem>>, vector<16x32xf32>
    %1 = arith.truncf %0 : vector<16x32xf32> to vector<16x32xbf16>
    %c0_1 = arith.constant 0 : index
    %c0_2 = arith.constant 0 : index
    %2 = vector.load %arg2[%c0_1, %c0_2] : memref<32x128xbf16, #tpu.memory_space<vmem>>, vector<32x128xbf16>
    %cst = arith.constant dense<0.000000e+00> : vector<16x128xf32>
    %3 = tpu.matmul %1, %2, %cst {dimension_numbers = #tpu.dot_dimension_numbers<[1], [0], [0], [1], [0, 0, 1, 1], [], []>} : vector<16x32xbf16>, vector<32x128xbf16>, vector<16x128xf32> -> vector<16x128xf32>
    %c0_3 = arith.constant 0 : index
    %c0_4 = arith.constant 0 : index
    %4 = vector.load %arg3[%c0_3, %c0_4] : memref<1x128xf32, #tpu.memory_space<vmem>>, vector<1x128xf32>
    %5 = vector.broadcast %4 : vector<1x128xf32> to vector<16x128xf32>
    %6 = arith.addf %3, %5 : vector<16x128xf32>
    %cst_5 = arith.constant 0.000000e+00 : f32
    %7 = vector.broadcast %cst_5 : f32 to vector<16x128xf32>
    %8 = arith.maximumf %6, %7 : vector<16x128xf32>
    %9 = arith.truncf %8 : vector<16x128xf32> to vector<16x128xbf16>
    %c0_6 = arith.constant 0 : index
    %c0_7 = arith.constant 0 : index
    %10 = vector.load %arg4[%c0_6, %c0_7] : memref<128x128xbf16, #tpu.memory_space<vmem>>, vector<128x128xbf16>
    %cst_8 = arith.constant dense<0.000000e+00> : vector<16x128xf32>
    %11 = tpu.matmul %9, %10, %cst_8 {dimension_numbers = #tpu.dot_dimension_numbers<[1], [0], [0], [1], [0, 0, 1, 1], [], []>} : vector<16x128xbf16>, vector<128x128xbf16>, vector<16x128xf32> -> vector<16x128xf32>
    %c0_9 = arith.constant 0 : index
    %c0_10 = arith.constant 0 : index
    %12 = vector.load %arg5[%c0_9, %c0_10] : memref<1x128xf32, #tpu.memory_space<vmem>>, vector<1x128xf32>
    %13 = vector.broadcast %12 : vector<1x128xf32> to vector<16x128xf32>
    %14 = arith.addf %11, %13 : vector<16x128xf32>
    %cst_11 = arith.constant 0.000000e+00 : f32
    %15 = vector.broadcast %cst_11 : f32 to vector<16x128xf32>
    %16 = arith.maximumf %14, %15 : vector<16x128xf32>
    %17 = arith.truncf %16 : vector<16x128xf32> to vector<16x128xbf16>
    %c0_12 = arith.constant 0 : index
    %c0_13 = arith.constant 0 : index
    %18 = vector.load %arg6[%c0_12, %c0_13] : memref<128x128xbf16, #tpu.memory_space<vmem>>, vector<128x128xbf16>
    %cst_14 = arith.constant dense<0.000000e+00> : vector<16x128xf32>
    %19 = tpu.matmul %17, %18, %cst_14 {dimension_numbers = #tpu.dot_dimension_numbers<[1], [0], [0], [1], [0, 0, 1, 1], [], []>} : vector<16x128xbf16>, vector<128x128xbf16>, vector<16x128xf32> -> vector<16x128xf32>
    %c0_15 = arith.constant 0 : index
    %c0_16 = arith.constant 0 : index
    %20 = vector.load %arg7[%c0_15, %c0_16] : memref<1x128xf32, #tpu.memory_space<vmem>>, vector<1x128xf32>
    %21 = vector.broadcast %20 : vector<1x128xf32> to vector<16x128xf32>
    %22 = arith.addf %19, %21 : vector<16x128xf32>
    %cst_17 = arith.constant dense<0xFF800000> : vector<16xf32>
    %23 = vector.multi_reduction <maximumf>, %22, %cst_17 [1] : vector<16x128xf32> to vector<16xf32>
    %24 = vector.shape_cast %23 : vector<16xf32> to vector<16x1xf32>
    %25 = vector.broadcast %24 : vector<16x1xf32> to vector<16x128xf32>
    %26 = arith.subf %22, %25 : vector<16x128xf32>
    %27 = math.exp %26 : vector<16x128xf32>
    %cst_18 = arith.constant dense<0.000000e+00> : vector<16xf32>
    %28 = vector.multi_reduction <add>, %27, %cst_18 [1] : vector<16x128xf32> to vector<16xf32>
    %29 = vector.shape_cast %28 : vector<16xf32> to vector<16x1xf32>
    %30 = vector.broadcast %29 : vector<16x1xf32> to vector<16x128xf32>
    %31 = arith.divf %27, %30 : vector<16x128xf32>
    %c0_19 = arith.constant 0 : index
    %c0_20 = arith.constant 0 : index
    %32 = vector.load %arg8[%c0_19, %c0_20] : memref<16x128xf32, #tpu.memory_space<vmem>>, vector<16x128xf32>
    tpu.vector_store %arg8[%c0_19, %c0_20], %31 {strides = array<i32>} : memref<16x128xf32, #tpu.memory_space<vmem>>, vector<16x128xf32>,
    return
  }
  func.func @transform_0(%arg0: i32) -> (i32, i32) {
    %c0_i32 = arith.constant 0 : i32
    %c0_i32_0 = arith.constant 0 : i32
    return %arg0, %c0_i32 : i32, i32
  }
  func.func @transform_1(%arg0: i32) -> (i32, i32) {
    %c0_i32 = arith.constant 0 : i32
    %c0_i32_0 = arith.constant 0 : i32
    %c0_i32_1 = arith.constant 0 : i32
    return %c0_i32, %c0_i32_0 : i32, i32
  }
  func.func @transform_2(%arg0: i32) -> (i32, i32) {
    %c0_i32 = arith.constant 0 : i32
    %c0_i32_0 = arith.constant 0 : i32
    %c0_i32_1 = arith.constant 0 : i32
    return %c0_i32, %c0_i32_0 : i32, i32
  }
  func.func @transform_3(%arg0: i32) -> (i32, i32) {
    %c0_i32 = arith.constant 0 : i32
    %c0_i32_0 = arith.constant 0 : i32
    %c0_i32_1 = arith.constant 0 : i32
    return %c0_i32, %c0_i32_0 : i32, i32
  }
  func.func @transform_4(%arg0: i32) -> (i32, i32) {
    %c0_i32 = arith.constant 0 : i32
    %c0_i32_0 = arith.constant 0 : i32
    %c0_i32_1 = arith.constant 0 : i32
    return %c0_i32, %c0_i32_0 : i32, i32
  }
  func.func @transform_5(%arg0: i32) -> (i32, i32) {
    %c0_i32 = arith.constant 0 : i32
    %c0_i32_0 = arith.constant 0 : i32
    %c0_i32_1 = arith.constant 0 : i32
    return %c0_i32, %c0_i32_0 : i32, i32
  }
  func.func @transform_6(%arg0: i32) -> (i32, i32) {
    %c0_i32 = arith.constant 0 : i32
    %c0_i32_0 = arith.constant 0 : i32
    %c0_i32_1 = arith.constant 0 : i32
    return %c0_i32, %c0_i32_0 : i32, i32
  }
  func.func @transform_7(%arg0: i32) -> (i32, i32) {
    %c0_i32 = arith.constant 0 : i32
    %c0_i32_0 = arith.constant 0 : i32
    return %arg0, %c0_i32 : i32, i32
  }
}

</mosaic_0001>

<bundles_post_ra>
// kernel: nn_forward.1
= control target key start
LH: loop header
LB: loop body
LE: loop exit
PB: predicated region body
PF: predicated region fallthrough
CT: control target
= control target key end

     0   :  { %s1205_s24 = smov 0   ;;  %s1207_s25 = smov 0   ;;  %s1375_s0 = inlined_call_operand.vmem [shape: f32[33,32], index: 0, kind: input, shape index: {}]   ;;  %s1376_s1 = inlined_call_operand.vmem [shape: bf16[32,128], index: 1, kind: input, shape index: {}]   ;;  %s1377_s2 = inlined_call_operand.vmem [shape: f32[1,128], index: 2, kind: input, shape index: {}]   ;;  %s1378_s3 = inlined_call_operand.vmem [shape: bf16[128,128], index: 3, kind: input, shape index: {}]   ;;  %s1379_s4 = inlined_call_operand.vmem [shape: f32[1,128], index: 4, kind: input, shape index: {}]   ;;  %s1380_s5 = inlined_call_operand.vmem [shape: bf16[128,128], index: 5, kind: input, shape index: {}]   ;;  %s1381_s6 = inlined_call_operand.vmem [shape: f32[1,128], index: 6, kind: input, shape index: {}]   ;;  %s1382_s7 = inlined_call_operand.vmem [shape: f32[33,128], index: 7, kind: output, shape index: {}]  }
   0x1   :  { %s1209_s26 = smov 0  }
   0x2 LB: > { %s1218_s27 = sadd.s32 4294967295, %s1129_s26   ;;  %s1220_s28 = sadd.s32 1, %s1129_s26   ;;  %s1129_s26 = sphi %s1209_s26, %s1386_s26   ;;  %s1125_s25 = sphi %s1207_s25, %s1385_s25   ;;  %s1121_s24 = sphi %s1205_s24, %s1384_s24  }
   0x3   : > { %s173_s29 = ssub.s32 %s1129_s26, %s1220_s28  ;;  %s176_s30 = sadd.s32 1, %s1125_s25 }
   0x4   : > { %p174_p0 = scmp.eq.s32.totalorder %s173_s29, 0  ;;  %p186_p1 = scmp.ne.s32.totalorder %s1125_s25, %s1121_s24 }
   0x5   : > { %p187_p2 = scmp.eq.s32.totalorder %s1218_s27, 2  ;;  %p844_p3 = scmp.ge.s32.totalorder %s1129_s26, 1 }
   0x6   : > { %s1228_s8 = scalar_select %p174_p0, %s1125_s25, %s176_s30  }
   0x7   : > { %p1230_p4 = por %p187_p2, %p186_p1  ;;  %p246_p5 = scmp.lt.s32.totalorder %s1129_s26, 4 }
   0x9   : > { %p247_p6 = pnand %p844_p3, %p246_p5 }
   0xa   : > { %v1049_v0 = vld [vmem:[%s1376_s1] sm:$0xff] (!%p247_p6)   ;;  %v1163_v1 = vmov (!%p247_p6), 0.0   ;;  %v1050_v2 = vld [vmem:[%s1376_s1 + $0x8] sm:$0xff] (!%p247_p6)   ;;  %vm1164_vm0 = vmmov (!%p247_p6), 0   ;;  %s1245_s14 = sshll.u32 (!%p247_p6), %s1218_s27, 1  ;;  %v1053_v5 = vld [vmem:[%s1378_s3 + $0x10] sm:$0xff] (!%p247_p6)  }
   0xb   : > { %250 = sbr.rel (%p247_p6) target bundleno = 1045 (0x415), region = 48  ;;  %911 = vmatprep.subr.bf16.mxu0 (!%p247_p6), %v1163_v1  ;;  %919 = vmatprep.subr.bf16.mxu1 (!%p247_p6), %v1163_v1  ;;  %p286_p7 = scmp.lt.s32.totalorder (!%p247_p6), %s1245_s14, 4  ;;  %v1051_v3 = vld [vmem:[%s1378_s3] sm:$0xff] (!%p247_p6)   ;;  %v1052_v4 = vld [vmem:[%s1378_s3 + $0x8] sm:$0xff] (!%p247_p6)   ;;  %vm327_vm1 = vcmask (!%p247_p6), 261120   ;;  %v1054_v9 = vld [vmem:[%s1378_s3 + $0x18] sm:$0xff] (!%p247_p6)  }
   0xc   : > { %912 = vmatpush3.bf16.msra.mxu0 (!%p247_p6), %v1049_v0  ;;  %915 = vmatprep.mubr.msk.bf16.mxu0 (!%p247_p6), %vm1164_vm0, %v1163_v1  ;;  %v1055_v10 = vld [vmem:[%s1378_s3 + $0x20] sm:$0xff] (!%p247_p6)   ;;  %v1056_v11 = vld [vmem:[%s1378_s3 + $0x28] sm:$0xff] (!%p247_p6)   ;;  %v1057_v12 = vld [vmem:[%s1378_s3 + $0x30] sm:$0xff] (!%p247_p6)   ;;  %s278_s30 = sand.u32 (!%p247_p6), 1, %s1121_s24  }
   0xd   : > { %913 = vmatprep.subr.bf16.mxu0 (!%p247_p6), %v1163_v1  ;;  %935 = vmatprep.mubr.msk.bf16.mxu1 (!%p247_p6), %vm1164_vm0, %v1163_v1  ;;  %v1058_v13 = vld [vmem:[%s1378_s3 + $0x38] sm:$0xff] (!%p247_p6)   ;;  %v1059_v14 = vld [vmem:[%s1380_s5] sm:$0xff] (!%p247_p6)   ;;  %v1060_v15 = vld [vmem:[%s1380_s5 + $0x8] sm:$0xff] (!%p247_p6)   ;;  %s845_s10 = sshll.u32 (!%p247_p6), %s278_s30, 4 }
   0xe   : > { %920 = vmatpush3.bf16.msra.mxu1 (!%p247_p6), %v1051_v3  ;;  %v1061_v16 = vld [vmem:[%s1380_s5 + $0x10] sm:$0xff] (!%p247_p6)   ;;  %v1062_v17 = vld [vmem:[%s1380_s5 + $0x18] sm:$0xff] (!%p247_p6)   ;;  %v1063_v18 = vld [vmem:[%s1380_s5 + $0x20] sm:$0xff] (!%p247_p6)   ;;  %s1330_s11 = scalar_lea.vmem (!%p247_p6), [#allocation2], %s845_s10  }
   0xf   : > { %921 = vmatprep.subr.bf16.mxu1 (!%p247_p6), %v1163_v1  ;;  %v1064_v19 = vld [vmem:[%s1380_s5 + $0x28] sm:$0xff] (!%p247_p6)   ;;  %v848_v20 = vld [vmem:[%s1377_s2] ss:$0 sm:$0xff] (!%p247_p6)  ;;  %v1065_v30 = vld [vmem:[%s1380_s5 + $0x30] sm:$0xff] (!%p247_p6)  }
  0x10   : > { %914 = vmatpush3.bf16.msra.mxu0 (!%p247_p6), %v1050_v2  ;;  %v1066_v31 = vld [vmem:[%s1380_s5 + $0x38] sm:$0xff] (!%p247_p6)   ;;  %v852_v32 = vld [vmem:[%s1379_s4] ss:$0 sm:$0xff] (!%p247_p6) }
  0x11   : > { %939 = vmatprep.subr.bf16.mxu0 (!%p247_p6), %v1163_v1  ;;  %v861_v42 = vld [vmem:[%s1381_s6] ss:$0 sm:$0xff] (!%p247_p6) }
  0x12   : > { %s287_s17 = scalar_select %p286_p7, %s1245_s14, 4  ;;  %922 = vmatpush3.bf16.msra.mxu1 %v1052_v4 }
  0x13   : > { %923 = vmatprep.subr.bf16.mxu1 %v1163_v1  ;;  %s630_s12 = ssub.s32 (%p1230_p4), 5, %s1245_s14  ;;  %s887_s13 = sshll.u32 (%p1230_p4), %s1218_s27, 4 }
  0x14   : > { %s847_s20 = sshll.u32 %s287_s17, 3  ;;  %p631_p8 = scmp.lt.s32.totalorder (%p1230_p4), %s630_s12, 2 }
  0x15   : > { %s289_s23 = scalar_lea.vmem %s1375_s0, %s847_s20  ;;  %s1341_s16 = scalar_lea.vmem (%p1230_p4), %s1382_s7, %s887_s13  }
  0x16   : > { %v301_v6 = vld [vmem:[%s289_s23] sm:$0xff]  ;;  %v302_v7 = vld [vmem:[%s289_s23 + $0x8] sm:$0xff]  ;;  %924 = vmatpush3.bf16.msra.mxu1 %v1053_v5 }
  0x17   : > { %v303_v8 = vpack.c.bf16 %v302_v7, %v301_v6  ;;  %925 = vmatprep.subr.bf16.mxu1 %v1163_v1 }
  0x19   : > { %916 = vmatmul.mubr.msk.bf16.vlgmr.msra.gmra.mrb[0].mxu0 %vm327_vm1, %v303_v8 }
  0x1a   : > { %955 = vmatprep.mubr.msk.bf16.mxu0 %vm1164_vm0, %v1163_v1  ;;  %926 = vmatpush3.bf16.msra.mxu1 %v1054_v9 }
  0x1b   : > { %927 = vmatprep.subr.bf16.mxu1 %v1163_v1  ;;  %940 = vmatpush3.bf16.msra.mxu0 %v1059_v14 }
  0x1c   : > { %941 = vmatprep.subr.bf16.mxu0 %v1163_v1 }
  0x1e   : > { %928 = vmatpush3.bf16.msra.mxu1 %v1055_v10 }
  0x1f   : > { %929 = vmatprep.subr.bf16.mxu1 %v1163_v1  ;;  %942 = vmatpush3.bf16.msra.mxu0 %v1060_v15 }
  0x20   : > { %943 = vmatprep.subr.bf16.mxu0 %v1163_v1 }
  0x22   : > { %930 = vmatpush3.bf16.msra.mxu1 %v1056_v11 }
  0x23   : > { %931 = vmatprep.subr.bf16.mxu1 %v1163_v1  ;;  %944 = vmatpush3.bf16.msra.mxu0 %v1061_v16 }
  0x24   : > { %945 = vmatprep.subr.bf16.mxu0 %v1163_v1 }
  0x26   : > { %932 = vmatpush3.bf16.msra.mxu1 %v1057_v12 }
  0x27   : > { %933 = vmatprep.subr.bf16.mxu1 %v1163_v1  ;;  %946 = vmatpush3.bf16.msra.mxu0 %v1062_v17 }
  0x28   : > { %947 = vmatprep.subr.bf16.mxu0 %v1163_v1 }
  0x2a   : > { %934 = vmatpush3.bf16.msra.mxu1 %v1058_v13 }
  0x2b   : > { %948 = vmatpush3.bf16.msra.mxu0 %v1063_v18 }
  0x2c   : > { %949 = vmatprep.subr.bf16.mxu0 %v1163_v1 }
  0x2f   : > { %950 = vmatpush3.bf16.msra.mxu0 %v1064_v19 }
  0x30   : > { %951 = vmatprep.subr.bf16.mxu0 %v1163_v1 }
  0x33   : > { %952 = vmatpush3.bf16.msra.mxu0 %v1065_v30 }
  0x34   : > { %953 = vmatprep.subr.bf16.mxu0 %v1163_v1 }
  0x37   : > { %954 = vmatpush3.bf16.msra.mxu0 %v1066_v31 }
  0xec   : > { %v365_v21 = vpop.f32.mrb[0].mxu0 }
  0xed   : > { %v366_v22 = vadd.f32 %v848_v20, %v365_v21  ;;  %v917_v23 = vpop.f32.mrb[1].mxu0 }
  0xee   : > { %v368_v24 = vpop.f32.mrb[2].mxu0 }
  0xef   : > { %v369_v25 = vadd.f32 %v848_v20, %v368_v24  ;;  %v918_v26 = vpop.f32.mrb[3].mxu0  ;;  %v372_v27 = vmax.f32 %v366_v22, 0.0 }
  0xf1   : > { %v373_v28 = vmax.f32 %v369_v25, 0.0 }
  0xf3   : > { %v374_v29 = vpack.c.bf16 %v373_v28, %v372_v27 }
  0xf5   : > { %936 = vmatmul.mubr.bf16.vlgmr.msra.gmra.mrb[0].mxu1 %v374_v29 }
 0x1c8   : > { %v480_v33 = vpop.f32.mrb[0].mxu1 }
 0x1c9   : > { %v481_v34 = vadd.f32 %v852_v32, %v480_v33  ;;  %v937_v35 = vpop.f32.mrb[1].mxu1 }
 0x1ca   : > { %v483_v36 = vpop.f32.mrb[2].mxu1 }
 0x1cb   : > { %v484_v37 = vadd.f32 %v852_v32, %v483_v36  ;;  %v938_v38 = vpop.f32.mrb[3].mxu1  ;;  %v487_v39 = vmax.f32 %v481_v34, 0.0 }
 0x1cd   : > { %v488_v40 = vmax.f32 %v484_v37, 0.0 }
 0x1cf   : > { %v489_v41 = vpack.c.bf16 %v488_v40, %v487_v39 }
 0x1d1   : > { %956 = vmatmul.mubr.bf16.vlgmr.msra.gmra.mrb[4].mxu0 %v489_v41 }
 0x2a4   : > { %v595_v43 = vpop.f32.mrb[4].mxu0 }
 0x2a5   : > { %v596_v44 = vadd.f32 %v861_v42, %v595_v43  ;;  %v957_v45 = vpop.f32.mrb[5].mxu0 }
 0x2a6   : > { %v598_v46 = vpop.f32.mrb[6].mxu0 }
 0x2a7   : > { %602 = vmax.xlane.f32.xlu0 %v596_v44  ;;  %v958_v47 = vpop.f32.mrb[7].mxu0  ;;  %v599_v48 = vadd.f32 %v861_v42, %v598_v46 }
 0x2ab   : > { %604 = vmax.xlane.f32.xlu0 %v599_v48 }
 0x334   : > { %v603_v49 = vpop.xlane.xlu0 %602 }
 0x335   : > { %v606_v50 = vsub.f32 %v596_v44, %v603_v49 }
 0x337   : > { %v608_v51 = vmul.f32 1.442695, %v606_v50 }
 0x338   : > { %v605_v52 = vpop.xlane.xlu0 %604 }
 0x339   : > { %1067 = vpow2.f32 %v608_v51  ;;  %v607_v53 = vsub.f32 %v599_v48, %v605_v52 }
 0x33b   : > { %v610_v54 = vmul.f32 1.442695, %v607_v53 }
 0x33d   : > { %1069 = vpow2.f32 %v610_v54 }
 0x343   : > { %v1068_v55 = vpop.eup %1067 }
 0x344   : > { %612 = vadd.xlane.f32.xlu1 %v1068_v55 }
 0x347   : > { %v1070_v56 = vpop.eup %1069 }
 0x348   : > { %614 = vadd.xlane.f32.xlu1 %v1070_v56 }
 0x3d1   : > { %v613_v57 = vpop.xlane.xlu1 %612 }
 0x3d2   : > { %1071 = vrcp.f32 %v613_v57 }
 0x3d5   : > { %v615_v58 = vpop.xlane.xlu1 %614 }
 0x3d6   : > { %1073 = vrcp.f32 %v615_v58 }
 0x3dc   : > { %v1072_v59 = vpop.eup %1071 }
 0x3dd   : > { %v617_v60 = vmul.f32 %v1072_v59, %v1068_v55  ;;  %628 = sbr.rel (!%p1230_p4) target bundleno = 1045 (0x415), region = 52 }
 0x3df   : > { %620 = vst [vmem:[%s1330_s11] sm:$0xff] %v617_v60 }
 0x3e0   : > { %v1074_v61 = vpop.eup %1073 }
 0x3e1   : > { %v619_v62 = vmul.f32 %v1074_v61, %v1070_v56 }
 0x3e3   : > { %621 = vst [vmem:[%s1330_s11 + $0x8] sm:$0xff] %v619_v62 }
 0x3e4   : > { %s1388_s12 = smov (!%p631_p8, %s630_s12), 2 }
 0x3e5   : > { %s872_s17 = sshll.u32 %s1388_s12, 7 }
 0x3e6   : > { %p875_p9 = scmp.eq.s32.totalorder %s872_s17, 0 }
 0x3e7   : > { %s1347_s18 = sshrl.u32 (!%p875_p9), %s1388_s12, 1 }
 0x3e8   : > { %639 = sbr.rel (%p875_p9) target bundleno = 1045 (0x415), region = 56  ;;  %p876_p10 = scmp.le.s32.totalorder (!%p875_p9), %s1347_s18, 0 }
 0x3ef   : > { %797 = sbr.rel (%p876_p10) target bundleno = 1024 (0x400), region = 132  ;;  %s1131_s27 = smov (!%p876_p10), %s1341_s16  }
 0x3f0   : > { %s1135_s9 = smov (!%p876_p10), %s1330_s11   ;;  %s1139_s14 = smov (!%p876_p10), 0  }
 0x3f1   : > { %s1143_s19 = smov (!%p876_p10), 0  }
 0x3f6 LB: >> { %v703_v63 = vld [vmem:[%s1137_s9] sm:$0xff]  ;;  %v705_v0 = vld [vmem:[%s1137_s9 + $0x8] sm:$0xff]  ;;  %s707_s20 = sadd.s32 1, %s1141_s14  ;;  %s697_s19 = sadd.s32 1, %s1145_s19   ;;  %s1145_s19 = sphi %s1143_s19, %s697_s19   ;;  %s1141_s14 = sphi %s1139_s14, %s1140_s14   ;;  %s1137_s9 = sphi %s1135_s9, %s712_s9   ;;  %s1133_s27 = sphi %s1131_s27, %s713_s27  }
 0x3f7   : >> { %704 = vst [vmem:[%s1133_s27] sm:$0xff] %v703_v63  ;;  %706 = vst [vmem:[%s1133_s27 + $0x8] sm:$0xff] %v705_v0  ;;  %p708_p11 = scmp.ge.s32.totalorder %s707_s20, %s1347_s18  ;;  %p696_p12 = scmp.ge.s32.totalorder %s697_s19, %s1347_s18 }
 0x3f9   : >> { %s1390_s20 = smov (%p708_p11, %s707_s20), 0  ;;  %699 = sbr.rel (!%p696_p12) target bundleno = 1014 (0x3f6), region = 138 }
 0x3fa   : >> { %s877_s21 = sshll.u32 %s1390_s20, 4  ;;  %s1140_s14 = smov %s1390_s20  }
 0x3fb   : >> { %s712_s9 = scalar_lea.vmem %s1330_s11, %s877_s21 [#allocation2]   ;;  %s713_s27 = scalar_lea.vmem %s1341_s16, %s877_s21  }
 0x400 PF: > { %s1357_s22 = sand.u32 1, %s1388_s12   ;;  %s888_s23 = sshll.u32 %s1347_s18, 4 }
 0x401   : > { %s718_s26 = scalar_lea.vmem %s1330_s11, %s888_s23 [#allocation2]   ;;  %s720_s29 = scalar_lea.vmem %s1341_s16, %s888_s23  }
 0x402   : > { %p882_p13 = scmp.le.s32.totalorder %s1357_s22, 0 }
 0x403   : > { %s1147_s30 = smov (!%p882_p13), %s720_s29   ;;  %s1151_s10 = smov (!%p882_p13), %s718_s26  }
 0x404   : > { %811 = sbr.rel (%p882_p13) target bundleno = 1045 (0x415), region = 143  ;;  %s1155_s13 = smov (!%p882_p13), 0  }
 0x405   : > { %s1159_s24 = smov (!%p882_p13), 0  }
 0x40b LB: >> { %v730_v1 = vld [vmem:[%s1153_s10] sm:$0xff]  ;;  %s732_s12 = sadd.s32 1, %s1157_s13  ;;  %s724_s24 = sadd.s32 1, %s1161_s24   ;;  %s1161_s24 = sphi %s1159_s24, %s724_s24   ;;  %s1157_s13 = sphi %s1155_s13, %s1156_s13   ;;  %s1153_s10 = sphi %s1151_s10, %s737_s10   ;;  %s1149_s30 = sphi %s1147_s30, %s738_s30  }
 0x40c   : >> { %731 = vst [vmem:[%s1149_s30] sm:$0xff] %v730_v1  ;;  %p733_p0 = scmp.ge.s32.totalorder %s732_s12, %s1357_s22  ;;  %p723_p1 = scmp.ge.s32.totalorder %s724_s24, %s1357_s22 }
 0x40e   : >> { %s1392_s12 = smov (%p733_p0, %s732_s12), 0  ;;  %726 = sbr.rel (!%p723_p1) target bundleno = 1035 (0x40b), region = 149 }
 0x40f   : >> { %s883_s11 = sshll.u32 %s1392_s12, 3  ;;  %s1156_s13 = smov %s1392_s12  }
 0x410   : >> { %s737_s10 = scalar_lea.vmem %s718_s26, %s883_s11 [#allocation2]   ;;  %s738_s30 = scalar_lea.vmem %s720_s29, %s883_s11  }
 0x415 PF: > { %p14_p2 = scmp.ge.s32.totalorder %s1220_s28, 5   ;;  %s1384_s24 = smov %s1125_s25 }
 0x416   : > { %s1385_s25 = smov %s1228_s8  ;;  %s1386_s26 = smov %s1220_s28 }
 0x417   :  { %16 = sbr.rel (!%p14_p2) target bundleno = 2 (0x2), region = 160 }

</bundles_post_ra>
